<compile_context>
chip_gen: v7x
topology: tpu7x:2x2x1
jax: 0.10.0
libtpu: 0.0.40
codegen_flags: <defaults>
</compile_context>

<pallas_src>
import functools

import jax
import jax.numpy as jnp
from jax.experimental import pallas as pl
from jax.experimental.pallas import tpu as pltpu


NEG_INF = -1e30      # additive mask bias for non-edges (exp underflows to 0)
M_INIT = -1e29       # running-max init; strictly > NEG_INF so fully-masked tiles
                     # produce exp(NEG_INF - M_INIT) == 0 (no spurious mass, no NaN)
TILE_NODES = 256     # dst-row tile == src tile (raise for large graphs, keep the
                     # dst axis >= 2 blocks so both v7x TensorCores get work)
VMEM_LIMIT = 32 * 1024 * 1024


# ------------------------------ Pallas kernels ------------------------------ #

def gat_project_kernel(x_ref, w_ref, h_ref, asrc_ref, adst_ref, *, hc, heads):
    """Fused projection x @ [W | W@Msrc | W@Mdst] -> (h, alpha_src, alpha_dst).

    bf16 MXU operands, f32 accumulation.  h is stored in bf16 (it is only ever
    consumed as a bf16 matmul operand downstream); the tiny alphas stay f32.
    """
    proj = jnp.dot(x_ref[...].astype(jnp.bfloat16),
                   w_ref[...].astype(jnp.bfloat16),
                   preferred_element_type=jnp.float32)          # [TM, hc + 2H]
    h_ref[...] = proj[:, :hc].astype(h_ref.dtype)
    asrc_ref[...] = proj[:, hc:hc + heads]
    adst_ref[...] = proj[:, hc + heads:hc + 2 * heads]


def gat_attn_kernel(adst_ref, asrcT_ref, h_ref, mask_ref, bias_ref, out_ref,
                    m_sc, l_sc, acc_sc, *, heads, out_ch, apply_relu):
    """GAT attention + aggregation for one (dst block, src block) grid point.

    Online softmax over the src axis (grid axis 1, 'arbitrary'):
      m_sc [TM,H] running max, l_sc [TM,H] running denom,
      acc_sc [TM,H*C] running unnormalized weighted sum of source features.
    """
    j = pl.program_id(1)

    @pl.when(j == 0)
    def _init():
        m_sc[...] = jnp.full_like(m_sc, M_INIT)
        l_sc[...] = jnp.zeros_like(l_sc)
        acc_sc[...] = jnp.zeros_like(acc_sc)

    # int8 mask expanded once per tile and shared across heads.
    mbias = jnp.where(mask_ref[...] > 0,
                      jnp.float32(0.0), jnp.float32(NEG_INF))   # [TM, TS]
    adst = adst_ref[...]                                        # [TM, H]
    asrcT = asrcT_ref[...]                                      # [H, TS]
    h_src = h_ref[...]                                          # [TS, H*C] bf16

    # Read scratch once (full-width loads), write once at the bottom.
    m_old = m_sc[...]                                           # [TM, H]
    l_old = l_sc[...]                                           # [TM, H]
    acc_old = acc_sc[...]                                       # [TM, H*C]

    m_parts, l_parts, acc_parts = [], [], []
    # NOTE: heads==2 here; for larger head counts switch to lax.fori_loop
    # (unroll=True) or cap TS to bound vreg pressure of the [TM,TS] temporaries.
    for hh in range(heads):
        lo, hi = hh * out_ch, (hh + 1) * out_ch
        # e[i, j] = LeakyReLU(alpha_dst[i] + alpha_src[j]) + mask_bias[i, j]
        e = adst[:, hh:hh + 1] + asrcT[hh:hh + 1, :]            # [TM, TS]
        e = jnp.maximum(e, jnp.float32(0.2) * e)                # LeakyReLU(0.2)
        e = e + mbias

        m_o = m_old[:, hh:hh + 1]                               # [TM, 1]
        m_n = jnp.maximum(m_o, jnp.max(e, axis=1, keepdims=True))
        a = jnp.exp(m_o - m_n)                                  # rescale factor
        p = jnp.exp(e - m_n)                                    # unnormalized attn
        l_parts.append(a * l_old[:, hh:hh + 1]
                       + jnp.sum(p, axis=1, keepdims=True))
        m_parts.append(m_n)
        acc_parts.append(a * acc_old[:, lo:hi]
                         + jnp.dot(p.astype(jnp.bfloat16), h_src[:, lo:hi],
                                   preferred_element_type=jnp.float32))

    m_new = jnp.concatenate(m_parts, axis=1)                    # [TM, H]
    l_new = jnp.concatenate(l_parts, axis=1)                    # [TM, H]
    acc_new = jnp.concatenate(acc_parts, axis=1)                # [TM, H*C]
    m_sc[...] = m_new                                           # one store each,
    l_sc[...] = l_new                                           # no per-head RMW
    acc_sc[...] = acc_new

    @pl.when(j == pl.num_programs(1) - 1)
    def _finalize():
        # Normalize once on the [TM, C] accumulators (not the [TM, TS] tile).
        l_safe = jnp.where(l_new > 0, l_new, jnp.float32(1.0))  # edgeless rows
        inv_l = pl.reciprocal(l_safe, approx=True)              # [TM, H] (EUP)
        pieces = [acc_new[:, hh * out_ch:(hh + 1) * out_ch] * inv_l[:, hh:hh + 1]
                  for hh in range(heads)]
        out = jnp.concatenate(pieces, axis=1) + bias_ref[...]
        if apply_relu:
            out = jnp.maximum(out, jnp.float32(0.0))
        out_ref[...] = out.astype(out_ref.dtype)                # single store


# ------------------------------ layer wrapper ------------------------------- #

def gat_conv_layer(x_pad, w_ext, bias, mask, *, heads, out_ch, apply_relu,
                   tile_nodes=TILE_NODES):
    """One GATConv layer on padded node features (concat=True, slope=0.2)."""
    n_pad, fin = x_pad.shape
    hc = heads * out_ch
    fe = w_ext.shape[1]                                 # H*C + 2*H
    grid_rows = n_pad // tile_nodes

    # 1) fused projection -> h (bf16), alpha_src, alpha_dst (no wrapper slicing)
    proj_kernel = functools.partial(gat_project_kernel, hc=hc, heads=heads)
    h, a_src, a_dst = pl.pallas_call(
        proj_kernel,
        out_shape=(jax.ShapeDtypeStruct((n_pad, hc), jnp.bfloat16),
                   jax.ShapeDtypeStruct((n_pad, heads), jnp.float32),
                   jax.ShapeDtypeStruct((n_pad, heads), jnp.float32)),
        grid=(grid_rows,),
        in_specs=[
            pl.BlockSpec((tile_nodes, fin), lambda i: (i, 0)),
            pl.BlockSpec((fin, fe), lambda i: (0, 0)),
        ],
        out_specs=(
            pl.BlockSpec((tile_nodes, hc), lambda i: (i, 0)),
            pl.BlockSpec((tile_nodes, heads), lambda i: (i, 0)),
            pl.BlockSpec((tile_nodes, heads), lambda i: (i, 0)),
        ),
        compiler_params=pltpu.CompilerParams(
            dimension_semantics=("parallel",),
            vmem_limit_bytes=VMEM_LIMIT),
    )(x_pad, w_ext)

    # Tiny [N_pad, H] -> [H, N_pad] transpose (a few KiB) done in XLA; avoids an
    # awkward narrow in-kernel transpose while keeping alpha_src lane-major.
    a_src_t = a_src.T

    # 2) tiled attention + aggregation with online softmax over src blocks
    attn_kernel = functools.partial(gat_attn_kernel, heads=heads, out_ch=out_ch,
                                    apply_relu=apply_relu)
    out = pl.pallas_call(
        attn_kernel,
        out_shape=jax.ShapeDtypeStruct((n_pad, hc), jnp.float32),
        grid=(grid_rows, grid_rows),
        in_specs=[
            pl.BlockSpec((tile_nodes, heads), lambda i, j: (i, 0)),      # alpha_dst
            pl.BlockSpec((heads, tile_nodes), lambda i, j: (0, j)),      # alpha_src^T
            pl.BlockSpec((tile_nodes, hc), lambda i, j: (j, 0)),         # h (sources)
            pl.BlockSpec((tile_nodes, tile_nodes), lambda i, j: (i, j)), # int8 mask
            pl.BlockSpec((1, hc), lambda i, j: (0, 0)),                  # bias
        ],
        out_specs=pl.BlockSpec((tile_nodes, hc), lambda i, j: (i, 0)),
        scratch_shapes=[
            pltpu.VMEM((tile_nodes, heads), jnp.float32),                # running max
            pltpu.VMEM((tile_nodes, heads), jnp.float32),                # running denom
            pltpu.VMEM((tile_nodes, hc), jnp.float32),                   # running acc
        ],
        compiler_params=pltpu.CompilerParams(
            dimension_semantics=("parallel", "arbitrary"),
            vmem_limit_bytes=VMEM_LIMIT),
    )(a_dst, a_src_t, h, mask, bias)
    return out


# --------------------------- parameter handling ---------------------------- #

def glorot(key, shape):
    fan_in, fan_out = shape[0], shape[-1]
    lim = (6.0 / (fan_in + fan_out)) ** 0.5
    return jax.random.uniform(key, shape, jnp.float32, -lim, lim)


def init_gat_encoder_params(key, in_channels, hidden_channels, num_layers, heads):
    params = []
    fin = in_channels
    for _ in range(num_layers):
        key, kw, ks, kd = jax.random.split(key, 4)
        w = glorot(kw, (fin, heads * hidden_channels))
        att_src = glorot(ks, (heads, hidden_channels))
        att_dst = glorot(kd, (heads, hidden_channels))
        bias = jnp.zeros((1, heads * hidden_channels), jnp.float32)
        params.append((w, att_src, att_dst, bias))
        fin = heads * hidden_channels
    return params


def att_selector_matrix(att, heads, out_ch):
    """[H*C, H] block matrix: (h @ M)[n, k] = sum_c h[n, k*C+c] * att[k, c]."""
    m = jnp.zeros((heads * out_ch, heads), jnp.float32)
    for k in range(heads):
        m = m.at[k * out_ch:(k + 1) * out_ch, k].set(att[k])
    return m


def build_w_ext(w, att_src, att_dst, heads, out_ch):
    """Fuse attention-scalar projections into the weight matmul (done once, XLA)."""
    m_src = att_selector_matrix(att_src, heads, out_ch)
    m_dst = att_selector_matrix(att_dst, heads, out_ch)
    return jnp.concatenate([w, w @ m_src, w @ m_dst], axis=1)   # [Fin, H*C + 2H]


def edge_index_to_adj(edge_index, n):
    """adj[dst, src] = 1, plus self loops (GATConv add_self_loops=True)."""
    src, dst = edge_index[0], edge_index[1]
    adj = jnp.zeros((n, n), jnp.float32).at[dst, src].set(1.0)
    adj = adj.at[jnp.arange(n), jnp.arange(n)].set(1.0)
    return adj


def edge_index_to_mask(edge_index, n_pad):
    """Padded int8 adjacency (1 on edges/self-loops, 0 elsewhere).

    Self-loops are set for ALL n_pad rows so padded rows have a non-empty
    neighborhood (no zero softmax denominator -> no NaN feeding later layers).
    """
    src, dst = edge_index[0], edge_index[1]
    adj = jnp.zeros((n_pad, n_pad), jnp.int8).at[dst, src].set(1)
    adj = adj.at[jnp.arange(n_pad), jnp.arange(n_pad)].set(1)
    return adj


def gat_encoder_forward(x, edge_index, params, *, heads, hidden_channels,
                        tile_nodes=TILE_NODES):
    n = x.shape[0]
    n_pad = ((n + tile_nodes - 1) // tile_nodes) * tile_nodes
    mask = edge_index_to_mask(edge_index, n_pad)       # int8, reused by all layers
    x_pad = jnp.zeros((n_pad, x.shape[1]), jnp.float32).at[:n].set(x)

    num_layers = len(params)
    h = x_pad
    for i, (w, att_src, att_dst, bias) in enumerate(params):
        w_ext = build_w_ext(w, att_src, att_dst, heads, hidden_channels)
        h = gat_conv_layer(h, w_ext, bias, mask, heads=heads,
                           out_ch=hidden_channels,
                           apply_relu=(i != num_layers - 1),
                           tile_nodes=tile_nodes)
    return h[:n]


# ------------------------- pure-JAX reference ------------------------------ #

def gat_encoder_ref(x, edge_index, params, *, heads, hidden_channels):
    n = x.shape[0]
    adj = edge_index_to_adj(edge_index, n)
    num_layers = len(params)
    c = hidden_channels
    for i, (w, att_src, att_dst, bias) in enumerate(params):
        h = x @ w
        hr = h.reshape(n, heads, c)
        a_s = (hr * att_src[None]).sum(-1)                # [N, H]
        a_d = (hr * att_dst[None]).sum(-1)                # [N, H]
        e = a_d[:, None, :] + a_s[None, :, :]             # [i, j, h]
        e = jnp.where(e > 0, e, 0.2 * e)
        e = jnp.where(adj[:, :, None] > 0, e, -1e30)
        e = e - e.max(axis=1, keepdims=True)
        p = jnp.where(adj[:, :, None] > 0, jnp.exp(e), 0.0)
        attn = p / p.sum(axis=1, keepdims=True)
        out = jnp.einsum('ijh,jhc->ihc', attn, hr).reshape(n, heads * c) + bias
        x = jnp.maximum(out, 0.0) if i != num_layers - 1 else out
    return x


# --------------------------------- main ------------------------------------ #

if __name__ == "__main__":
    key = jax.random.PRNGKey(0)

    N = 400                # pads to 512 -> 2x2 attention grid at TILE_NODES=256
    IN_CHANNELS = 8
    HIDDEN_CHANNELS = 16
    HEADS = 2
    NUM_LAYERS = 2

    key, kx, kp = jax.random.split(key, 3)
    x = jax.random.normal(kx, (N, IN_CHANNELS), jnp.float32)

    # Deterministic small graph: bidirectional ring.
    src = jnp.concatenate([jnp.arange(N), (jnp.arange(N) + 1) % N])
    dst = jnp.concatenate([(jnp.arange(N) + 1) % N, jnp.arange(N)])
    edge_index = jnp.stack([src, dst], axis=0).astype(jnp.int32)   # [2, E]

    params = init_gat_encoder_params(kp, IN_CHANNELS, HIDDEN_CHANNELS,
                                     NUM_LAYERS, HEADS)

    out = gat_encoder_forward(x, edge_index, params, heads=HEADS,
                              hidden_channels=HIDDEN_CHANNELS)
    out = jax.block_until_ready(out)

    ref = gat_encoder_ref(x, edge_index, params, heads=HEADS,
                          hidden_channels=HIDDEN_CHANNELS)
    assert out.shape == (N, HEADS * HIDDEN_CHANNELS)
    assert not bool(jnp.any(jnp.isnan(out))), "NaN in kernel output"
    # Tolerance covers bf16 matmul operands (f32 accumulate), the approximate EUP
    # reciprocal, and online-softmax reassociation vs the pure-f32 reference.
    max_err = float(jnp.max(jnp.abs(out - ref)))
    assert jnp.allclose(out, ref, rtol=5e-2, atol=5e-2), \
        f"mismatch vs reference (max abs err {max_err})"

    print("KERNEL_OK")
</pallas_src>

<mosaic_0001>
module attributes {stable_mosaic.version = 11 : i64} {
  func.func @gat_project_kernel(%arg0: i32, %arg1: memref<256x8xf32, #tpu.memory_space<vmem>>, %arg2: memref<8x36xf32, #tpu.memory_space<vmem>>, %arg3: memref<256x32xbf16, #tpu.memory_space<vmem>>, %arg4: memref<256x2xf32, #tpu.memory_space<vmem>>, %arg5: memref<256x2xf32, #tpu.memory_space<vmem>>) attributes {dimension_semantics = [#tpu.dimension_semantics<parallel>], iteration_bounds = array<i64: 2>, scalar_prefetch = 0 : i64, scratch_operands = 0 : i64, tpu.core_type = #tpu.core_type<tc>, window_params = [{transform_indices = @transform_0, window_bounds = array<i64: 256, 8>}, {pipeline_mode = #tpu.pipeline_mode<synchronous>, transform_indices = @transform_1, window_bounds = array<i64: 8, 36>}, {transform_indices = @transform_2, window_bounds = array<i64: 256, 32>}, {transform_indices = @transform_3, window_bounds = array<i64: 256, 2>}, {transform_indices = @transform_4, window_bounds = array<i64: 256, 2>}]} {
    %c0 = arith.constant 0 : index
    %c0_0 = arith.constant 0 : index
    %0 = vector.load %arg1[%c0, %c0_0] : memref<256x8xf32, #tpu.memory_space<vmem>>, vector<256x8xf32>
    %1 = arith.truncf %0 : vector<256x8xf32> to vector<256x8xbf16>
    %c0_1 = arith.constant 0 : index
    %c0_2 = arith.constant 0 : index
    %2 = vector.load %arg2[%c0_1, %c0_2] : memref<8x36xf32, #tpu.memory_space<vmem>>, vector<8x36xf32>
    %3 = arith.truncf %2 : vector<8x36xf32> to vector<8x36xbf16>
    %cst = arith.constant dense<0.000000e+00> : vector<256x36xf32>
    %4 = tpu.matmul %1, %3, %cst {dimension_numbers = #tpu.dot_dimension_numbers<[1], [0], [0], [1], [0, 0, 1, 1], [], []>} : vector<256x8xbf16>, vector<8x36xbf16>, vector<256x36xf32> -> vector<256x36xf32>
    %5 = vector.extract_strided_slice %4 {offsets = [0, 0], sizes = [256, 32], strides = [1, 1]} : vector<256x36xf32> to vector<256x32xf32>
    %6 = arith.truncf %5 : vector<256x32xf32> to vector<256x32xbf16>
    %c0_3 = arith.constant 0 : index
    %c0_4 = arith.constant 0 : index
    %7 = vector.load %arg3[%c0_3, %c0_4] : memref<256x32xbf16, #tpu.memory_space<vmem>>, vector<256x32xbf16>
    tpu.vector_store %arg3[%c0_3, %c0_4], %6 {strides = array<i32>} : memref<256x32xbf16, #tpu.memory_space<vmem>>, vector<256x32xbf16>,
    %8 = vector.extract_strided_slice %4 {offsets = [0, 32], sizes = [256, 2], strides = [1, 1]} : vector<256x36xf32> to vector<256x2xf32>
    %c0_5 = arith.constant 0 : index
    %c0_6 = arith.constant 0 : index
    %9 = vector.load %arg4[%c0_5, %c0_6] : memref<256x2xf32, #tpu.memory_space<vmem>>, vector<256x2xf32>
    tpu.vector_store %arg4[%c0_5, %c0_6], %8 {strides = array<i32>} : memref<256x2xf32, #tpu.memory_space<vmem>>, vector<256x2xf32>,
    %10 = vector.extract_strided_slice %4 {offsets = [0, 34], sizes = [256, 2], strides = [1, 1]} : vector<256x36xf32> to vector<256x2xf32>
    %c0_7 = arith.constant 0 : index
    %c0_8 = arith.constant 0 : index
    %11 = vector.load %arg5[%c0_7, %c0_8] : memref<256x2xf32, #tpu.memory_space<vmem>>, vector<256x2xf32>
    tpu.vector_store %arg5[%c0_7, %c0_8], %10 {strides = array<i32>} : memref<256x2xf32, #tpu.memory_space<vmem>>, vector<256x2xf32>,
    return
  }
  func.func @transform_0(%arg0: i32) -> (i32, i32) {
    %c0_i32 = arith.constant 0 : i32
    %c0_i32_0 = arith.constant 0 : i32
    return %arg0, %c0_i32 : i32, i32
  }
  func.func @transform_1(%arg0: i32) -> (i32, i32) {
    %c0_i32 = arith.constant 0 : i32
    %c0_i32_0 = arith.constant 0 : i32
    %c0_i32_1 = arith.constant 0 : i32
    return %c0_i32, %c0_i32_0 : i32, i32
  }
  func.func @transform_2(%arg0: i32) -> (i32, i32) {
    %c0_i32 = arith.constant 0 : i32
    %c0_i32_0 = arith.constant 0 : i32
    return %arg0, %c0_i32 : i32, i32
  }
  func.func @transform_3(%arg0: i32) -> (i32, i32) {
    %c0_i32 = arith.constant 0 : i32
    %c0_i32_0 = arith.constant 0 : i32
    return %arg0, %c0_i32 : i32, i32
  }
  func.func @transform_4(%arg0: i32) -> (i32, i32) {
    %c0_i32 = arith.constant 0 : i32
    %c0_i32_0 = arith.constant 0 : i32
    return %arg0, %c0_i32 : i32, i32
  }
}

</mosaic_0001>

<bundles_post_ra>
// kernel: tpu_custom_call.1
= control target key start
LH: loop header
LB: loop body
LE: loop exit
PB: predicated region body
PF: predicated region fallthrough
CT: control target
= control target key end

     0   :  { %s1262_s15 = smov 0   ;;  %s1771_s0 = inlined_call_operand.vmem [shape: f32[512,8], index: 0, kind: input, shape index: {}]   ;;  %s1772_s1 = inlined_call_operand.vmem [shape: f32[8,36], index: 1, kind: input, shape index: {}]   ;;  %s1773_s2 = inlined_call_operand.vmem [shape: bf16[512,32], index: 2, kind: output, shape index: {0}]   ;;  %s1774_s3 = inlined_call_operand.vmem [shape: f32[512,2], index: 3, kind: output, shape index: {1}]   ;;  %s1775_s4 = inlined_call_operand.vmem [shape: f32[512,2], index: 4, kind: output, shape index: {2}]  }
   0x1 LB: > { %s1067_s16 = sadd.s32 4294967295, %s1233_s15   ;;  %p1071_p0 = scmp.ge.s32.totalorder %s1233_s15, 1  ;;  %s1233_s15 = sphi %s1262_s15, %s15_s15  }
   0x2   : > { %p168_p1 = scmp.lt.s32.totalorder %s1233_s15, 3 }
   0x4   : > { %p169_p2 = pnand %p1071_p0, %p168_p1 }
   0x5   : > { %v277_v0 = vld [vmem:[%s1772_s1] sm:$0xff] (!%p169_p2)  ;;  %vm328_vm0 = vcmask (!%p169_p2), 1043456   ;;  %s1072_s19 = sshll.u32 (!%p169_p2), %s1067_s16, 5  ;;  %vm279_vm1 = vcmask (!%p169_p2), 64512   ;;  %vm621_vm2 = vcmask (!%p169_p2), 257024   ;;  %s1235_s28 = smov (!%p169_p2), 96  }
   0x6   : > { %172 = sbr.rel (%p169_p2) target bundleno = 473 (0x1d9), region = 28  ;;  %v278_v1 = vpack.c.bf16 (!%p169_p2), %v277_v0, %v277_v0  ;;  %p205_p3 = scmp.lt.s32.totalorder (!%p169_p2), %s1072_s19, 63  ;;  %vm782_vm3 = vcmask (!%p169_p2), 15360  }
   0x7   : > { %s1236_s29 = smov (!%p169_p2), 94  }
   0x8   : > { %1215 = vmatprep.subr.msk.bf16.mxu0 (!%p169_p2), %vm328_vm0, %v278_v1  ;;  %1216 = vmatprep.subr.msk.bf16.mxu1 (!%p169_p2), %vm328_vm0, %v278_v1  ;;  %v330_v2 = vsel (!%p169_p2), %vm328_vm0, %v278_v1, 0 }
   0x9   : > { %1180 = vmatpush3.bf16.msra.mxu0 (!%p169_p2), %v330_v2  ;;  %1214 = vmatpush3.bf16.msra.mxu1 (!%p169_p2), %v330_v2 }
   0xd   : > { %s1777_s19 = smov (!%p205_p3, %s1072_s19), 63 }
   0xe   : > { %s1276_s20 = sshll.u32 %s1777_s19, 3  ;;  %s1075_s24 = sshll.u32 %s1777_s19, 2 }
   0xf   : > { %s1282_s23 = scalar_lea.vmem %s1771_s0, %s1276_s20  ;;  %s1336_s27 = scalar_lea.vmem %s1773_s2, %s1075_s24 }
  0x10   : > { %v229_v3 = vld [vmem:[%s1282_s23] sm:$0xff]  ;;  %v230_v4 = vld [vmem:[%s1282_s23 + $0x8] sm:$0xff]  ;;  %v231_v8 = vld [vmem:[%s1282_s23 + $0x10] sm:$0xff]  ;;  %s1618_s6 = scalar_lea.vmem %s1774_s3, %s1276_s20  ;;  %s1634_s9 = scalar_lea.vmem %s1775_s4, %s1276_s20 }
  0x11   : > { %v245_v5 = vld [vmem:[%s1282_s23 + $0x80] sm:$0xff]  ;;  %v261_v6 = vpack.c.bf16 %v230_v4, %v229_v3  ;;  %v246_v7 = vld [vmem:[%s1282_s23 + $0x88] sm:$0xff]  ;;  %v232_v9 = vld [vmem:[%s1282_s23 + $0x18] sm:$0xff] }
  0x12   : > { %v269_v10 = vpack.c.bf16 %v246_v7, %v245_v5  ;;  %v262_v11 = vpack.c.bf16 %v232_v9, %v231_v8  ;;  %v247_v12 = vld [vmem:[%s1282_s23 + $0x90] sm:$0xff]  ;;  %v248_v13 = vld [vmem:[%s1282_s23 + $0x98] sm:$0xff]  ;;  %v233_v14 = vld [vmem:[%s1282_s23 + $0x20] sm:$0xff] }
  0x13   : > { %1181 = vmatprep.mubr.msk.bf16.mxu0 %vm279_vm1, %v261_v6  ;;  %v270_v15 = vpack.c.bf16 %v248_v13, %v247_v12  ;;  %v234_v16 = vld [vmem:[%s1282_s23 + $0x28] sm:$0xff]  ;;  %v249_v18 = vld [vmem:[%s1282_s23 + $0xa0] sm:$0xff]  ;;  %v235_v20 = vld [vmem:[%s1282_s23 + $0x30] sm:$0xff] }
  0x14   : > { %1197 = vmatprep.mubr.msk.bf16.mxu1 %vm279_vm1, %v269_v10  ;;  %1182 = vmatmul.mubr.msk.bf16.vlgmr.msra.gmra.mrb[0].mxu0 %vm279_vm1, %v262_v11  ;;  %v263_v17 = vpack.c.bf16 %v234_v16, %v233_v14  ;;  %v250_v19 = vld [vmem:[%s1282_s23 + $0xa8] sm:$0xff]  ;;  %v236_v21 = vld [vmem:[%s1282_s23 + $0x38] sm:$0xff]  ;;  %v251_v23 = vld [vmem:[%s1282_s23 + $0xb0] sm:$0xff] }
  0x15   : > { %1198 = vmatmul.mubr.msk.bf16.vlgmr.msra.gmra.mrb[0].mxu1 %vm279_vm1, %v270_v15  ;;  %v271_v22 = vpack.c.bf16 %v250_v19, %v249_v18  ;;  %v252_v24 = vld [vmem:[%s1282_s23 + $0xb8] sm:$0xff]  ;;  %v237_v25 = vld [vmem:[%s1282_s23 + $0x40] sm:$0xff]  ;;  %v238_v26 = vld [vmem:[%s1282_s23 + $0x48] sm:$0xff]  ;;  %v264_v29 = vpack.c.bf16 %v236_v21, %v235_v20 }
  0x16   : > { %1185 = vmatprep.mubr.msk.bf16.mxu0 %vm279_vm1, %v263_v17  ;;  %v253_v27 = vld [vmem:[%s1282_s23 + $0xc0] sm:$0xff]  ;;  %v254_v28 = vld [vmem:[%s1282_s23 + $0xc8] sm:$0xff]  ;;  %v272_v30 = vpack.c.bf16 %v252_v24, %v251_v23  ;;  %v265_v31 = vpack.c.bf16 %v238_v26, %v237_v25  ;;  %v239_v33 = vld [vmem:[%s1282_s23 + $0x50] sm:$0xff] }
  0x17   : > { %1201 = vmatprep.mubr.msk.bf16.mxu1 %vm279_vm1, %v271_v22  ;;  %v273_v32 = vpack.c.bf16 %v254_v28, %v253_v27  ;;  %v240_v34 = vld [vmem:[%s1282_s23 + $0x58] sm:$0xff]  ;;  %v255_v35 = vld [vmem:[%s1282_s23 + $0xd0] sm:$0xff]  ;;  %v241_v37 = vld [vmem:[%s1282_s23 + $0x60] sm:$0xff] }
  0x18   : > { %v256_v36 = vld [vmem:[%s1282_s23 + $0xd8] sm:$0xff]  ;;  %v242_v38 = vld [vmem:[%s1282_s23 + $0x68] sm:$0xff]  ;;  %v257_v39 = vld [vmem:[%s1282_s23 + $0xe0] sm:$0xff]  ;;  %v266_v41 = vpack.c.bf16 %v240_v34, %v239_v33 }
  0x19   : > { %v258_v40 = vld [vmem:[%s1282_s23 + $0xe8] sm:$0xff]  ;;  %v274_v42 = vpack.c.bf16 %v256_v36, %v255_v35  ;;  %v267_v43 = vpack.c.bf16 %v242_v38, %v241_v37  ;;  %v243_v45 = vld [vmem:[%s1282_s23 + $0x70] sm:$0xff]  ;;  %v244_v46 = vld [vmem:[%s1282_s23 + $0x78] sm:$0xff] }
  0x1a   : > { %v275_v44 = vpack.c.bf16 %v258_v40, %v257_v39  ;;  %v259_v47 = vld [vmem:[%s1282_s23 + $0xf0] sm:$0xff]  ;;  %v260_v48 = vld [vmem:[%s1282_s23 + $0xf8] sm:$0xff]  ;;  %v268_v49 = vpack.c.bf16 %v244_v46, %v243_v45 }
  0x1b   : > { %v276_v50 = vpack.c.bf16 %v260_v48, %v259_v47 }
  0x1c   : > { %1186 = vmatmul.mubr.msk.bf16.gmra.mrb[4].mxu0 %vm279_vm1, %v264_v29 }
  0x1d   : > { %1202 = vmatmul.mubr.msk.bf16.gmra.mrb[4].mxu1 %vm279_vm1, %v272_v30  ;;  %1189 = vmatprep.mubr.msk.bf16.mxu0 %vm279_vm1, %v265_v31 }
  0x1e   : > { %1205 = vmatprep.mubr.msk.bf16.mxu1 %vm279_vm1, %v273_v32 }
  0x24   : > { %1190 = vmatmul.mubr.msk.bf16.gmra.mrb[8].mxu0 %vm279_vm1, %v266_v41 }
  0x25   : > { %1206 = vmatmul.mubr.msk.bf16.gmra.mrb[8].mxu1 %vm279_vm1, %v274_v42  ;;  %1193 = vmatprep.mubr.msk.bf16.mxu0 %vm279_vm1, %v267_v43 }
  0x26   : > { %1209 = vmatprep.mubr.msk.bf16.mxu1 %vm279_vm1, %v275_v44 }
  0x2c   : > { %1194 = vmatmul.mubr.msk.bf16.gmra.mrb[12].mxu0 %vm279_vm1, %v268_v49 }
  0x2d   : > { %1210 = vmatmul.mubr.msk.bf16.gmra.mrb[12].mxu1 %vm279_vm1, %v276_v50 }
  0xe7   : > { %v1183_v51 = vpop.f32.mrb[0].mxu0 }
  0xe8   : > { %v1132_v52 = vpack.c.bf16 %v1183_v51, %v1183_v51  ;;  %v1199_v53 = vpop.f32.mrb[0].mxu1  ;;  %690 = vrot.lane.b32.xlu1 %v1183_v51, %s1235_s28  ;;  %v1339_v54 = vpop.f32.mrb[1].mxu0 }
  0xe9   : > { %v1148_v55 = vpack.c.bf16 %v1199_v53, %v1199_v53  ;;  %722 = vrot.lane.b32.xlu0 %v1199_v53, %s1235_s28  ;;  %v1342_v56 = vpop.f32.mrb[1].mxu1  ;;  %v1130_v57 = vpack.c.bf16 %v1339_v54, %v1339_v54  ;;  %v1184_v58 = vpop.f32.mrb[2].mxu0 }
  0xea   : > { %624 = vst.msk [vmem:[%s1336_s27 + $0x8] sm:$0xf] %vm621_vm2, %v1132_v52  ;;  %v1146_v59 = vpack.c.bf16 %v1342_v56, %v1342_v56  ;;  %v1133_v60 = vpack.c.bf16 %v1184_v58, %v1184_v58  ;;  %v1200_v61 = vpop.f32.mrb[2].mxu1  ;;  %v1350_v62 = vpop.f32.mrb[3].mxu0 }
  0xeb   : > { %640 = vst.msk [vmem:[%s1336_s27 + $0x48] sm:$0xf] %vm621_vm2, %v1148_v55  ;;  %622 = vst.msk [vmem:[%s1336_s27] sm:$0xf] %vm621_vm2, %v1130_v57  ;;  %v1149_v63 = vpack.c.bf16 %v1200_v61, %v1200_v61  ;;  %v1131_v0 = vpack.c.bf16 %v1350_v62, %v1350_v62  ;;  %v1358_v1 = vpop.f32.mrb[3].mxu1 }
  0xec   : > { %638 = vst.msk [vmem:[%s1336_s27 + $0x40] sm:$0xf] %vm621_vm2, %v1146_v59  ;;  %625 = vst.msk [vmem:[%s1336_s27 + $0xc] sm:$0xf] %vm621_vm2, %v1133_v60  ;;  %v1147_v2 = vpack.c.bf16 %v1358_v1, %v1358_v1  ;;  %692 = vrot.lane.b32.xlu1 %v1184_v58, %s1235_s28 }
  0xed   : > { %641 = vst.msk [vmem:[%s1336_s27 + $0x4c] sm:$0xf] %vm621_vm2, %v1149_v63  ;;  %623 = vst.msk [vmem:[%s1336_s27 + $0x4] sm:$0xf] %vm621_vm2, %v1131_v0  ;;  %819 = vrot.lane.b32.xlu0 %v1183_v51, %s1236_s29 }
  0xee   : > { %639 = vst.msk [vmem:[%s1336_s27 + $0x44] sm:$0xf] %vm621_vm2, %v1147_v2 }
  0xef   : > { %v1374_v3 = vpop.f32.mrb[4].mxu0 }
  0xf0   : > { %724 = vrot.lane.b32.xlu1 %v1200_v61, %s1235_s28  ;;  %v1136_v4 = vpack.c.bf16 %v1374_v3, %v1374_v3  ;;  %v1379_v5 = vpop.f32.mrb[5].mxu0  ;;  %v1381_v6 = vpop.f32.mrb[4].mxu1 }
  0xf1   : > { %851 = vrot.lane.b32.xlu0 %v1199_v53, %s1236_s29  ;;  %v1134_v7 = vpack.c.bf16 %v1379_v5, %v1379_v5  ;;  %v1386_v8 = vpop.f32.mrb[6].mxu0  ;;  %v1152_v9 = vpack.c.bf16 %v1381_v6, %v1381_v6  ;;  %v1390_v10 = vpop.f32.mrb[5].mxu1 }
  0xf2   : > { %628 = vst.msk [vmem:[%s1336_s27 + $0x18] sm:$0xf] %vm621_vm2, %v1136_v4  ;;  %v1137_v11 = vpack.c.bf16 %v1386_v8, %v1386_v8  ;;  %v1396_v12 = vpop.f32.mrb[7].mxu0  ;;  %v1150_v13 = vpack.c.bf16 %v1390_v10, %v1390_v10  ;;  %v1400_v14 = vpop.f32.mrb[6].mxu1 }
  0xf3   : > { %626 = vst.msk [vmem:[%s1336_s27 + $0x10] sm:$0xf] %vm621_vm2, %v1134_v7  ;;  %v1135_v15 = vpack.c.bf16 %v1396_v12, %v1396_v12  ;;  %644 = vst.msk [vmem:[%s1336_s27 + $0x58] sm:$0xf] %vm621_vm2, %v1152_v9  ;;  %v1153_v16 = vpack.c.bf16 %v1400_v14, %v1400_v14  ;;  %v1410_v17 = vpop.f32.mrb[7].mxu1 }
  0xf4   : > { %821 = vrot.lane.b32.xlu1 %v1184_v58, %s1236_s29  ;;  %629 = vst.msk [vmem:[%s1336_s27 + $0x1c] sm:$0xf] %vm621_vm2, %v1137_v11  ;;  %642 = vst.msk [vmem:[%s1336_s27 + $0x50] sm:$0xf] %vm621_vm2, %v1150_v13  ;;  %v1151_v18 = vpack.c.bf16 %v1410_v17, %v1410_v17 }
  0xf5   : > { %686 = vrot.lane.b32.xlu0 %v1339_v54, %s1235_s28  ;;  %627 = vst.msk [vmem:[%s1336_s27 + $0x14] sm:$0xf] %vm621_vm2, %v1135_v15  ;;  %645 = vst.msk [vmem:[%s1336_s27 + $0x5c] sm:$0xf] %vm621_vm2, %v1153_v16 }
  0xf6   : > { %643 = vst.msk [vmem:[%s1336_s27 + $0x54] sm:$0xf] %vm621_vm2, %v1151_v18 }
  0xf7   : > { %v1427_v19 = vpop.f32.mrb[8].mxu0 }
  0xf8   : > { %853 = vrot.lane.b32.xlu1 %v1200_v61, %s1236_s29  ;;  %v1140_v20 = vpack.c.bf16 %v1427_v19, %v1427_v19  ;;  %v1432_v21 = vpop.f32.mrb[9].mxu0  ;;  %v1434_v22 = vpop.f32.mrb[8].mxu1 }
  0xf9   : > { %718 = vrot.lane.b32.xlu0 %v1342_v56, %s1235_s28  ;;  %v1138_v23 = vpack.c.bf16 %v1432_v21, %v1432_v21  ;;  %v1440_v24 = vpop.f32.mrb[10].mxu0  ;;  %v1156_v25 = vpack.c.bf16 %v1434_v22, %v1434_v22  ;;  %v1444_v26 = vpop.f32.mrb[9].mxu1 }
  0xfa   : > { %632 = vst.msk [vmem:[%s1336_s27 + $0x28] sm:$0xf] %vm621_vm2, %v1140_v20  ;;  %v1141_v27 = vpack.c.bf16 %v1440_v24, %v1440_v24  ;;  %v1450_v28 = vpop.f32.mrb[11].mxu0  ;;  %v1154_v29 = vpack.c.bf16 %v1444_v26, %v1444_v26  ;;  %v1454_v30 = vpop.f32.mrb[10].mxu1 }
  0xfb   : > { %630 = vst.msk [vmem:[%s1336_s27 + $0x20] sm:$0xf] %vm621_vm2, %v1138_v23  ;;  %v1139_v31 = vpack.c.bf16 %v1450_v28, %v1450_v28  ;;  %648 = vst.msk [vmem:[%s1336_s27 + $0x68] sm:$0xf] %vm621_vm2, %v1156_v25  ;;  %v1157_v32 = vpack.c.bf16 %v1454_v30, %v1454_v30  ;;  %v1464_v33 = vpop.f32.mrb[11].mxu1 }
  0xfc   : > { %720 = vrot.lane.b32.xlu1 %v1358_v1, %s1235_s28  ;;  %633 = vst.msk [vmem:[%s1336_s27 + $0x2c] sm:$0xf] %vm621_vm2, %v1141_v27  ;;  %646 = vst.msk [vmem:[%s1336_s27 + $0x60] sm:$0xf] %vm621_vm2, %v1154_v29  ;;  %v1155_v34 = vpack.c.bf16 %v1464_v33, %v1464_v33 }
  0xfd   : > { %815 = vrot.lane.b32.xlu0 %v1339_v54, %s1236_s29  ;;  %631 = vst.msk [vmem:[%s1336_s27 + $0x24] sm:$0xf] %vm621_vm2, %v1139_v31  ;;  %649 = vst.msk [vmem:[%s1336_s27 + $0x6c] sm:$0xf] %vm621_vm2, %v1157_v32 }
  0xfe   : > { %647 = vst.msk [vmem:[%s1336_s27 + $0x64] sm:$0xf] %vm621_vm2, %v1155_v34 }
  0xff   : > { %v1482_v35 = vpop.f32.mrb[12].mxu0 }
 0x100   : > { %817 = vrot.lane.b32.xlu1 %v1350_v62, %s1236_s29  ;;  %v1144_v36 = vpack.c.bf16 %v1482_v35, %v1482_v35  ;;  %v1488_v37 = vpop.f32.mrb[13].mxu0  ;;  %v1490_v38 = vpop.f32.mrb[12].mxu1 }
 0x101   : > { %847 = vrot.lane.b32.xlu0 %v1342_v56, %s1236_s29  ;;  %v1142_v39 = vpack.c.bf16 %v1488_v37, %v1488_v37  ;;  %v1196_v40 = vpop.f32.mrb[14].mxu0  ;;  %v1160_v41 = vpack.c.bf16 %v1490_v38, %v1490_v38  ;;  %v1498_v42 = vpop.f32.mrb[13].mxu1 }
 0x102   : > { %636 = vst.msk [vmem:[%s1336_s27 + $0x38] sm:$0xf] %vm621_vm2, %v1144_v36  ;;  %v1145_v43 = vpack.c.bf16 %v1196_v40, %v1196_v40  ;;  %v1502_v44 = vpop.f32.mrb[15].mxu0  ;;  %v1158_v45 = vpack.c.bf16 %v1498_v42, %v1498_v42  ;;  %v1506_v46 = vpop.f32.mrb[14].mxu1 }
 0x103   : > { %634 = vst.msk [vmem:[%s1336_s27 + $0x30] sm:$0xf] %vm621_vm2, %v1142_v39  ;;  %v1143_v47 = vpack.c.bf16 %v1502_v44, %v1502_v44  ;;  %652 = vst.msk [vmem:[%s1336_s27 + $0x78] sm:$0xf] %vm621_vm2, %v1160_v41  ;;  %v1161_v48 = vpack.c.bf16 %v1506_v46, %v1506_v46  ;;  %v1516_v49 = vpop.f32.mrb[15].mxu1 }
 0x104   : > { %849 = vrot.lane.b32.xlu1 %v1358_v1, %s1236_s29  ;;  %637 = vst.msk [vmem:[%s1336_s27 + $0x3c] sm:$0xf] %vm621_vm2, %v1145_v43  ;;  %650 = vst.msk [vmem:[%s1336_s27 + $0x70] sm:$0xf] %vm621_vm2, %v1158_v45  ;;  %v1159_v50 = vpack.c.bf16 %v1516_v49, %v1516_v49 }
 0x105   : > { %688 = vrot.lane.b32.xlu0 %v1350_v62, %s1235_s28  ;;  %635 = vst.msk [vmem:[%s1336_s27 + $0x34] sm:$0xf] %vm621_vm2, %v1143_v47  ;;  %653 = vst.msk [vmem:[%s1336_s27 + $0x7c] sm:$0xf] %vm621_vm2, %v1161_v48 }
 0x106   : > { %651 = vst.msk [vmem:[%s1336_s27 + $0x74] sm:$0xf] %vm621_vm2, %v1159_v50 }
 0x108   : > { %700 = vrot.lane.b32.xlu1 %v1386_v8, %s1235_s28 }
 0x109   : > { %698 = vrot.lane.b32.xlu0 %v1374_v3, %s1235_s28 }
 0x10c   : > { %732 = vrot.lane.b32.xlu1 %v1400_v14, %s1235_s28 }
 0x10d   : > { %730 = vrot.lane.b32.xlu0 %v1381_v6, %s1235_s28 }
 0x110   : > { %829 = vrot.lane.b32.xlu1 %v1386_v8, %s1236_s29 }
 0x111   : > { %827 = vrot.lane.b32.xlu0 %v1374_v3, %s1236_s29 }
 0x114   : > { %861 = vrot.lane.b32.xlu1 %v1400_v14, %s1236_s29 }
 0x115   : > { %859 = vrot.lane.b32.xlu0 %v1381_v6, %s1236_s29 }
 0x118   : > { %696 = vrot.lane.b32.xlu1 %v1396_v12, %s1235_s28 }
 0x119   : > { %694 = vrot.lane.b32.xlu0 %v1379_v5, %s1235_s28 }
 0x11c   : > { %728 = vrot.lane.b32.xlu1 %v1410_v17, %s1235_s28 }
 0x11d   : > { %726 = vrot.lane.b32.xlu0 %v1390_v10, %s1235_s28 }
 0x120   : > { %825 = vrot.lane.b32.xlu1 %v1396_v12, %s1236_s29 }
 0x121   : > { %823 = vrot.lane.b32.xlu0 %v1379_v5, %s1236_s29 }
 0x124   : > { %857 = vrot.lane.b32.xlu1 %v1410_v17, %s1236_s29 }
 0x125   : > { %855 = vrot.lane.b32.xlu0 %v1390_v10, %s1236_s29 }
 0x128   : > { %708 = vrot.lane.b32.xlu1 %v1440_v24, %s1235_s28 }
 0x129   : > { %706 = vrot.lane.b32.xlu0 %v1427_v19, %s1235_s28 }
 0x12c   : > { %740 = vrot.lane.b32.xlu1 %v1454_v30, %s1235_s28 }
 0x12d   : > { %738 = vrot.lane.b32.xlu0 %v1434_v22, %s1235_s28 }
 0x130   : > { %837 = vrot.lane.b32.xlu1 %v1440_v24, %s1236_s29 }
 0x131   : > { %835 = vrot.lane.b32.xlu0 %v1427_v19, %s1236_s29 }
 0x134   : > { %869 = vrot.lane.b32.xlu1 %v1454_v30, %s1236_s29 }
 0x135   : > { %867 = vrot.lane.b32.xlu0 %v1434_v22, %s1236_s29 }
 0x138   : > { %704 = vrot.lane.b32.xlu1 %v1450_v28, %s1235_s28 }
 0x139   : > { %702 = vrot.lane.b32.xlu0 %v1432_v21, %s1235_s28 }
 0x13c   : > { %736 = vrot.lane.b32.xlu1 %v1464_v33, %s1235_s28 }
 0x13d   : > { %734 = vrot.lane.b32.xlu0 %v1444_v26, %s1235_s28 }
 0x140   : > { %833 = vrot.lane.b32.xlu1 %v1450_v28, %s1236_s29 }
 0x141   : > { %831 = vrot.lane.b32.xlu0 %v1432_v21, %s1236_s29 }
 0x144   : > { %865 = vrot.lane.b32.xlu1 %v1464_v33, %s1236_s29 }
 0x145   : > { %863 = vrot.lane.b32.xlu0 %v1444_v26, %s1236_s29 }
 0x148   : > { %716 = vrot.lane.b32.xlu1 %v1196_v40, %s1235_s28 }
 0x149   : > { %714 = vrot.lane.b32.xlu0 %v1482_v35, %s1235_s28 }
 0x14c   : > { %748 = vrot.lane.b32.xlu1 %v1506_v46, %s1235_s28 }
 0x14d   : > { %746 = vrot.lane.b32.xlu0 %v1490_v38, %s1235_s28 }
 0x150   : > { %845 = vrot.lane.b32.xlu1 %v1196_v40, %s1236_s29 }
 0x151   : > { %843 = vrot.lane.b32.xlu0 %v1482_v35, %s1236_s29 }
 0x154   : > { %712 = vrot.lane.b32.xlu1 %v1502_v44, %s1235_s28 }
 0x155   : > { %710 = vrot.lane.b32.xlu0 %v1488_v37, %s1235_s28 }
 0x158   : > { %744 = vrot.lane.b32.xlu1 %v1516_v49, %s1235_s28 }
 0x159   : > { %742 = vrot.lane.b32.xlu0 %v1498_v42, %s1235_s28 }
 0x15a   : > { %v691_v51 = vpop.permute.xlu1 %690 }
 0x15b   : > { %v723_v52 = vpop.permute.xlu0 %722  ;;  %785 = vst.msk [vmem:[%s1618_s6 + $0x10] sm:$0xff] %vm782_vm3, %v691_v51 }
 0x15c   : > { %801 = vst.msk [vmem:[%s1618_s6 + $0x90] sm:$0xff] %vm782_vm3, %v723_v52  ;;  %841 = vrot.lane.b32.xlu1 %v1502_v44, %s1236_s29 }
 0x15d   : > { %839 = vrot.lane.b32.xlu0 %v1488_v37, %s1236_s29 }
 0x15e   : > { %v693_v53 = vpop.permute.xlu1 %692 }
 0x15f   : > { %v820_v54 = vpop.permute.xlu0 %819  ;;  %786 = vst.msk [vmem:[%s1618_s6 + $0x18] sm:$0xff] %vm782_vm3, %v693_v53 }
 0x160   : > { %913 = vst.msk [vmem:[%s1634_s9 + $0x10] sm:$0xff] %vm782_vm3, %v820_v54  ;;  %873 = vrot.lane.b32.xlu1 %v1516_v49, %s1236_s29 }
 0x161   : > { %871 = vrot.lane.b32.xlu0 %v1498_v42, %s1236_s29 }
 0x162   : > { %v725_v55 = vpop.permute.xlu1 %724 }
 0x163   : > { %v852_v56 = vpop.permute.xlu0 %851  ;;  %802 = vst.msk [vmem:[%s1618_s6 + $0x98] sm:$0xff] %vm782_vm3, %v725_v55 }
 0x164   : > { %929 = vst.msk [vmem:[%s1634_s9 + $0x90] sm:$0xff] %vm782_vm3, %v852_v56  ;;  %877 = vrot.lane.b32.xlu1 %v1506_v46, %s1236_s29 }
 0x165   : > { %875 = vrot.lane.b32.xlu0 %v1490_v38, %s1236_s29 }
 0x166   : > { %v822_v57 = vpop.permute.xlu1 %821 }
 0x167   : > { %v687_v58 = vpop.permute.xlu0 %686  ;;  %914 = vst.msk [vmem:[%s1634_s9 + $0x18] sm:$0xff] %vm782_vm3, %v822_v57 }
 0x168   : > { %783 = vst.msk [vmem:[%s1618_s6] sm:$0xff] %vm782_vm3, %v687_v58 }
 0x16a   : > { %v854_v59 = vpop.permute.xlu1 %853 }
 0x16b   : > { %v719_v60 = vpop.permute.xlu0 %718  ;;  %930 = vst.msk [vmem:[%s1634_s9 + $0x98] sm:$0xff] %vm782_vm3, %v854_v59 }
 0x16c   : > { %799 = vst.msk [vmem:[%s1618_s6 + $0x80] sm:$0xff] %vm782_vm3, %v719_v60 }
 0x16e   : > { %v721_v61 = vpop.permute.xlu1 %720 }
 0x16f   : > { %v816_v62 = vpop.permute.xlu0 %815  ;;  %800 = vst.msk [vmem:[%s1618_s6 + $0x88] sm:$0xff] %vm782_vm3, %v721_v61 }
 0x170   : > { %911 = vst.msk [vmem:[%s1634_s9] sm:$0xff] %vm782_vm3, %v816_v62 }
 0x172   : > { %v818_v63 = vpop.permute.xlu1 %817 }
 0x173   : > { %v848_v0 = vpop.permute.xlu0 %847  ;;  %912 = vst.msk [vmem:[%s1634_s9 + $0x8] sm:$0xff] %vm782_vm3, %v818_v63 }
 0x174   : > { %927 = vst.msk [vmem:[%s1634_s9 + $0x80] sm:$0xff] %vm782_vm3, %v848_v0 }
 0x176   : > { %v850_v1 = vpop.permute.xlu1 %849 }
 0x177   : > { %928 = vst.msk [vmem:[%s1634_s9 + $0x88] sm:$0xff] %vm782_vm3, %v850_v1  ;;  %v689_v2 = vpop.permute.xlu0 %688 }
 0x178   : > { %784 = vst.msk [vmem:[%s1618_s6 + $0x8] sm:$0xff] %vm782_vm3, %v689_v2 }
 0x17a   : > { %v701_v3 = vpop.permute.xlu1 %700 }
 0x17b   : > { %v699_v4 = vpop.permute.xlu0 %698  ;;  %790 = vst.msk [vmem:[%s1618_s6 + $0x38] sm:$0xff] %vm782_vm3, %v701_v3 }
 0x17c   : > { %789 = vst.msk [vmem:[%s1618_s6 + $0x30] sm:$0xff] %vm782_vm3, %v699_v4 }
 0x17e   : > { %v733_v5 = vpop.permute.xlu1 %732 }
 0x17f   : > { %v731_v6 = vpop.permute.xlu0 %730  ;;  %806 = vst.msk [vmem:[%s1618_s6 + $0xb8] sm:$0xff] %vm782_vm3, %v733_v5 }
 0x180   : > { %805 = vst.msk [vmem:[%s1618_s6 + $0xb0] sm:$0xff] %vm782_vm3, %v731_v6 }
 0x182   : > { %v830_v7 = vpop.permute.xlu1 %829 }
 0x183   : > { %v828_v8 = vpop.permute.xlu0 %827  ;;  %918 = vst.msk [vmem:[%s1634_s9 + $0x38] sm:$0xff] %vm782_vm3, %v830_v7 }
 0x184   : > { %917 = vst.msk [vmem:[%s1634_s9 + $0x30] sm:$0xff] %vm782_vm3, %v828_v8 }
 0x186   : > { %v862_v9 = vpop.permute.xlu1 %861 }
 0x187   : > { %v860_v10 = vpop.permute.xlu0 %859  ;;  %934 = vst.msk [vmem:[%s1634_s9 + $0xb8] sm:$0xff] %vm782_vm3, %v862_v9 }
 0x188   : > { %933 = vst.msk [vmem:[%s1634_s9 + $0xb0] sm:$0xff] %vm782_vm3, %v860_v10 }
 0x18a   : > { %v697_v11 = vpop.permute.xlu1 %696 }
 0x18b   : > { %v695_v12 = vpop.permute.xlu0 %694  ;;  %788 = vst.msk [vmem:[%s1618_s6 + $0x28] sm:$0xff] %vm782_vm3, %v697_v11 }
 0x18c   : > { %787 = vst.msk [vmem:[%s1618_s6 + $0x20] sm:$0xff] %vm782_vm3, %v695_v12 }
 0x18e   : > { %v729_v13 = vpop.permute.xlu1 %728 }
 0x18f   : > { %v727_v14 = vpop.permute.xlu0 %726  ;;  %804 = vst.msk [vmem:[%s1618_s6 + $0xa8] sm:$0xff] %vm782_vm3, %v729_v13 }
 0x190   : > { %803 = vst.msk [vmem:[%s1618_s6 + $0xa0] sm:$0xff] %vm782_vm3, %v727_v14 }
 0x192   : > { %v826_v15 = vpop.permute.xlu1 %825 }
 0x193   : > { %v824_v16 = vpop.permute.xlu0 %823  ;;  %916 = vst.msk [vmem:[%s1634_s9 + $0x28] sm:$0xff] %vm782_vm3, %v826_v15 }
 0x194   : > { %915 = vst.msk [vmem:[%s1634_s9 + $0x20] sm:$0xff] %vm782_vm3, %v824_v16 }
 0x196   : > { %v858_v17 = vpop.permute.xlu1 %857 }
 0x197   : > { %v856_v18 = vpop.permute.xlu0 %855  ;;  %932 = vst.msk [vmem:[%s1634_s9 + $0xa8] sm:$0xff] %vm782_vm3, %v858_v17 }
 0x198   : > { %931 = vst.msk [vmem:[%s1634_s9 + $0xa0] sm:$0xff] %vm782_vm3, %v856_v18 }
 0x19a   : > { %v709_v19 = vpop.permute.xlu1 %708 }
 0x19b   : > { %v707_v20 = vpop.permute.xlu0 %706  ;;  %794 = vst.msk [vmem:[%s1618_s6 + $0x58] sm:$0xff] %vm782_vm3, %v709_v19 }
 0x19c   : > { %793 = vst.msk [vmem:[%s1618_s6 + $0x50] sm:$0xff] %vm782_vm3, %v707_v20 }
 0x19e   : > { %v741_v21 = vpop.permute.xlu1 %740 }
 0x19f   : > { %v739_v22 = vpop.permute.xlu0 %738  ;;  %810 = vst.msk [vmem:[%s1618_s6 + $0xd8] sm:$0xff] %vm782_vm3, %v741_v21 }
 0x1a0   : > { %809 = vst.msk [vmem:[%s1618_s6 + $0xd0] sm:$0xff] %vm782_vm3, %v739_v22 }
 0x1a2   : > { %v838_v23 = vpop.permute.xlu1 %837 }
 0x1a3   : > { %v836_v24 = vpop.permute.xlu0 %835  ;;  %922 = vst.msk [vmem:[%s1634_s9 + $0x58] sm:$0xff] %vm782_vm3, %v838_v23 }
 0x1a4   : > { %921 = vst.msk [vmem:[%s1634_s9 + $0x50] sm:$0xff] %vm782_vm3, %v836_v24 }
 0x1a6   : > { %v870_v25 = vpop.permute.xlu1 %869 }
 0x1a7   : > { %v868_v26 = vpop.permute.xlu0 %867  ;;  %938 = vst.msk [vmem:[%s1634_s9 + $0xd8] sm:$0xff] %vm782_vm3, %v870_v25 }
 0x1a8   : > { %937 = vst.msk [vmem:[%s1634_s9 + $0xd0] sm:$0xff] %vm782_vm3, %v868_v26 }
 0x1aa   : > { %v705_v27 = vpop.permute.xlu1 %704 }
 0x1ab   : > { %v703_v28 = vpop.permute.xlu0 %702  ;;  %792 = vst.msk [vmem:[%s1618_s6 + $0x48] sm:$0xff] %vm782_vm3, %v705_v27 }
 0x1ac   : > { %791 = vst.msk [vmem:[%s1618_s6 + $0x40] sm:$0xff] %vm782_vm3, %v703_v28 }
 0x1ae   : > { %v737_v29 = vpop.permute.xlu1 %736 }
 0x1af   : > { %v735_v30 = vpop.permute.xlu0 %734  ;;  %808 = vst.msk [vmem:[%s1618_s6 + $0xc8] sm:$0xff] %vm782_vm3, %v737_v29 }
 0x1b0   : > { %807 = vst.msk [vmem:[%s1618_s6 + $0xc0] sm:$0xff] %vm782_vm3, %v735_v30 }
 0x1b2   : > { %v834_v31 = vpop.permute.xlu1 %833 }
 0x1b3   : > { %v832_v32 = vpop.permute.xlu0 %831  ;;  %920 = vst.msk [vmem:[%s1634_s9 + $0x48] sm:$0xff] %vm782_vm3, %v834_v31 }
 0x1b4   : > { %919 = vst.msk [vmem:[%s1634_s9 + $0x40] sm:$0xff] %vm782_vm3, %v832_v32 }
 0x1b6   : > { %v866_v33 = vpop.permute.xlu1 %865 }
 0x1b7   : > { %v864_v34 = vpop.permute.xlu0 %863  ;;  %936 = vst.msk [vmem:[%s1634_s9 + $0xc8] sm:$0xff] %vm782_vm3, %v866_v33 }
 0x1b8   : > { %935 = vst.msk [vmem:[%s1634_s9 + $0xc0] sm:$0xff] %vm782_vm3, %v864_v34 }
 0x1ba   : > { %v717_v35 = vpop.permute.xlu1 %716 }
 0x1bb   : > { %v715_v36 = vpop.permute.xlu0 %714  ;;  %798 = vst.msk [vmem:[%s1618_s6 + $0x78] sm:$0xff] %vm782_vm3, %v717_v35 }
 0x1bc   : > { %797 = vst.msk [vmem:[%s1618_s6 + $0x70] sm:$0xff] %vm782_vm3, %v715_v36 }
 0x1be   : > { %v749_v37 = vpop.permute.xlu1 %748 }
 0x1bf   : > { %v747_v38 = vpop.permute.xlu0 %746  ;;  %814 = vst.msk [vmem:[%s1618_s6 + $0xf8] sm:$0xff] %vm782_vm3, %v749_v37 }
 0x1c0   : > { %813 = vst.msk [vmem:[%s1618_s6 + $0xf0] sm:$0xff] %vm782_vm3, %v747_v38 }
 0x1c2   : > { %v846_v39 = vpop.permute.xlu1 %845 }
 0x1c3   : > { %v844_v40 = vpop.permute.xlu0 %843  ;;  %926 = vst.msk [vmem:[%s1634_s9 + $0x78] sm:$0xff] %vm782_vm3, %v846_v39 }
 0x1c4   : > { %925 = vst.msk [vmem:[%s1634_s9 + $0x70] sm:$0xff] %vm782_vm3, %v844_v40 }
 0x1c6   : > { %v713_v41 = vpop.permute.xlu1 %712 }
 0x1c7   : > { %v711_v42 = vpop.permute.xlu0 %710  ;;  %796 = vst.msk [vmem:[%s1618_s6 + $0x68] sm:$0xff] %vm782_vm3, %v713_v41 }
 0x1c8   : > { %795 = vst.msk [vmem:[%s1618_s6 + $0x60] sm:$0xff] %vm782_vm3, %v711_v42 }
 0x1ca   : > { %v745_v43 = vpop.permute.xlu1 %744 }
 0x1cb   : > { %v743_v44 = vpop.permute.xlu0 %742  ;;  %812 = vst.msk [vmem:[%s1618_s6 + $0xe8] sm:$0xff] %vm782_vm3, %v745_v43 }
 0x1cc   : > { %811 = vst.msk [vmem:[%s1618_s6 + $0xe0] sm:$0xff] %vm782_vm3, %v743_v44 }
 0x1ce   : > { %v842_v45 = vpop.permute.xlu1 %841 }
 0x1cf   : > { %v840_v46 = vpop.permute.xlu0 %839  ;;  %924 = vst.msk [vmem:[%s1634_s9 + $0x68] sm:$0xff] %vm782_vm3, %v842_v45 }
 0x1d0   : > { %923 = vst.msk [vmem:[%s1634_s9 + $0x60] sm:$0xff] %vm782_vm3, %v840_v46 }
 0x1d2   : > { %v874_v47 = vpop.permute.xlu1 %873 }
 0x1d3   : > { %v872_v48 = vpop.permute.xlu0 %871  ;;  %940 = vst.msk [vmem:[%s1634_s9 + $0xe8] sm:$0xff] %vm782_vm3, %v874_v47 }
 0x1d4   : > { %939 = vst.msk [vmem:[%s1634_s9 + $0xe0] sm:$0xff] %vm782_vm3, %v872_v48 }
 0x1d6   : > { %v878_v49 = vpop.permute.xlu1 %877 }
 0x1d7   : > { %v876_v50 = vpop.permute.xlu0 %875  ;;  %942 = vst.msk [vmem:[%s1634_s9 + $0xf8] sm:$0xff] %vm782_vm3, %v878_v49 }
 0x1d8   : > { %941 = vst.msk [vmem:[%s1634_s9 + $0xf0] sm:$0xff] %vm782_vm3, %v876_v50 }
 0x1d9 PF: > { %s15_s15 = sadd.s32 1, %s1233_s15  }
 0x1da   : > { %p12_p4 = scmp.ge.s32.totalorder %s15_s15, 4  }
 0x1dc   :  { %14 = sbr.rel (!%p12_p4) target bundleno = 1 (0x1), region = 82 }

</bundles_post_ra>
